<compile_context>
chip_gen: v6e
topology: v6e:2x2x1
jax: 0.10.0
libtpu: 0.0.40
codegen_flags: <defaults>
</compile_context>

<pallas_src>
import functools

import jax
import jax.numpy as jnp
from jax.experimental import pallas as pl
from jax.experimental.pallas import tpu as pltpu

# ---------------- problem sizes (small, consistent with the module) ----------------
NUM_CLASSES = 4
SEQ_LEN = 2
CHANNELS = 3
SPATIAL = 16                                     # stand-in for 112 at small scale
BATCH = 2
D_IN = SEQ_LEN * CHANNELS * SPATIAL * SPATIAL    # 1536
HIDDEN = 32
C_PAD = 128                                      # lane-dense classifier head width

assert D_IN % 128 == 0   # [W_dec | W_cls] concat boundary falls on a lane boundary

RECON_X, PRED, TARGET, X = "recon_x", "pred", "target", "x"
RECONSTRUCTION_LOSS, CLASSIFICATION_LOSS, LOSS, ACC = (
    "reconstruction_loss", "classification_loss", "loss", "acc")


def _round_up(v, m):
    return ((v + m - 1) // m) * m


# ------------------------------ fused Pallas kernel ---------------------------------
def general_ae_kernel(x_ref, we_ref, be_ref, wcat_ref, bcat_ref, t_ref,   # inputs
                      recon_ref, logits_ref, metrics_ref,                 # outputs
                      *, batch, num_classes, d_in, c_pad, compute_cls):
    """Single invocation: encode -> fused decode+classifier matmul -> metrics."""
    x = x_ref[...]                                              # (b_pad, D_IN) f32, read once

    # encode(): relu(x @ W_enc + b_enc) — bf16 operands, f32 MXU accumulation
    z = jnp.maximum(
        jnp.dot(x.astype(jnp.bfloat16), we_ref[...],
                preferred_element_type=jnp.float32) + be_ref[...], 0.0)

    # decode() + classifier head fused: one MXU matmul against W_cat = [W_dec | W_cls]
    out = jnp.dot(z.astype(jnp.bfloat16), wcat_ref[...],
                  preferred_element_type=jnp.float32) + bcat_ref[...]     # (b_pad, D_IN+C_PAD)
    recon = jnp.tanh(out[:, :d_in])                             # decode(): tanh, f32
    logits = out[:, d_in:]                                      # (b_pad, c_pad) lane-dense

    recon_ref[...] = recon.astype(recon_ref.dtype)              # bf16 writeback
    logits_ref[...] = logits                                    # f32, lane-dense (no masked vst)

    # _calculate_batched_reconstruction_loss: mean of per-chunk MSE == global mean
    d = recon[:batch] - x[:batch]                               # static slice, no row mask
    recon_loss = jnp.sum(d * d) / jnp.float32(batch * d_in)
    metrics_ref[0] = recon_loss

    if compute_cls:
        lg = logits[:batch]
        target = t_ref[...][:batch]                             # (batch, 1) int32
        col = jax.lax.broadcasted_iota(jnp.int32, (batch, c_pad), 1)
        cls_ok = col < num_classes

        # classification loss: cross-entropy (log-softmax gathered at target)
        ml = jnp.where(cls_ok, lg, jnp.float32(-1e30))
        m = jnp.max(ml, axis=1, keepdims=True)
        lse = jnp.log(jnp.sum(jnp.where(cls_ok, jnp.exp(ml - m), 0.0),
                              axis=1, keepdims=True)) + m
        onehot = jnp.logical_and(col == target, cls_ok).astype(jnp.float32)
        picked = jnp.sum(lg * onehot, axis=1, keepdims=True)
        ce = jnp.sum(lse - picked) / batch

        # calculate_accuracy: argmax(softmax(logits)) == argmax(logits) (first max)
        argmax = jnp.min(jnp.where(ml == m, col, c_pad), axis=1, keepdims=True)
        acc = jnp.sum((argmax == target).astype(jnp.float32)) / batch

        loss = recon_loss + jnp.where(jnp.isnan(ce), 0.0, ce)   # torch.isnan gate
        metrics_ref[1] = ce
        metrics_ref[2] = loss
        metrics_ref[3] = acc
    else:
        metrics_ref[1] = 0.0
        metrics_ref[2] = recon_loss
        metrics_ref[3] = 0.0


# ------------------------------ JAX wrapper (GeneralAE) -----------------------------
class GeneralAE:
    def __init__(self, num_classes=NUM_CLASSES, sequence_length=SEQ_LEN):
        self.num_classes = num_classes
        self.sequence_length = sequence_length
        k = jax.random.PRNGKey(42)
        k_we, k_wd, k_wc = jax.random.split(k, 3)
        # matmul operands stored bf16 (halves HBM weight traffic); accumulation stays f32.
        self.w_enc = (jax.random.normal(k_we, (D_IN, HIDDEN), jnp.float32)
                      * 0.02).astype(jnp.bfloat16)
        self.b_enc = jnp.zeros((1, HIDDEN), jnp.float32)
        self.w_dec = (jax.random.normal(k_wd, (HIDDEN, D_IN), jnp.float32)
                      * 0.02).astype(jnp.bfloat16)
        self.b_dec = jnp.zeros((1, D_IN), jnp.float32)
        w_cls = jax.random.normal(k_wc, (HIDDEN, num_classes), jnp.float32) * 0.02
        # classifier padded to a lane-dense 128-wide head; sliced back in the wrapper.
        self.w_cls = (jnp.zeros((HIDDEN, C_PAD), jnp.float32)
                      .at[:, :num_classes].set(w_cls).astype(jnp.bfloat16))
        self.b_cls = jnp.zeros((1, C_PAD), jnp.float32)
        # decode + classifier fused into one RHS: W_cat = [W_dec | W_cls]
        self.w_cat = jnp.concatenate([self.w_dec, self.w_cls], axis=1)    # (HIDDEN, D_IN+C_PAD)
        self.b_cat = jnp.concatenate([self.b_dec, self.b_cls], axis=1)    # (1, D_IN+C_PAD)

    # ------------------------------- fused pallas_call -------------------------------
    def _fused_call(self, x, target, compute_cls):
        b = x.shape[0]
        b_pad = max(8, _round_up(b, 8))          # fill f32 sublanes / MXU rows
        x_flat = x.reshape(b, -1).astype(jnp.float32)
        x_pad = jnp.zeros((b_pad, D_IN), jnp.float32).at[:b].set(x_flat)
        t_pad = jnp.zeros((b_pad, 1), jnp.int32).at[:b, 0].set(target.astype(jnp.int32))

        kernel = functools.partial(
            general_ae_kernel, batch=b, num_classes=self.num_classes,
            d_in=D_IN, c_pad=C_PAD, compute_cls=compute_cls)

        flops = (2 * b_pad * D_IN * HIDDEN                       # encode matmul
                 + 2 * b_pad * HIDDEN * (D_IN + C_PAD))          # fused decode+cls matmul
        bytes_accessed = (b_pad * D_IN * 4                       # x read once
                          + D_IN * HIDDEN * 2                    # bf16 w_enc
                          + HIDDEN * (D_IN + C_PAD) * 2          # bf16 w_cat
                          + b_pad * D_IN * 2                     # bf16 recon write
                          + b_pad * C_PAD * 4)                   # logits write
        cost = pl.CostEstimate(
            flops=flops,
            transcendentals=b_pad * D_IN + (b_pad * C_PAD if compute_cls else 0),
            bytes_accessed=bytes_accessed)

        recon_pad, logits_pad, metrics = pl.pallas_call(
            kernel,
            out_shape=(
                jax.ShapeDtypeStruct((b_pad, D_IN), jnp.bfloat16),   # recon (bf16 writeback)
                jax.ShapeDtypeStruct((b_pad, C_PAD), jnp.float32),   # logits (lane-dense)
                jax.ShapeDtypeStruct((4,), jnp.float32),             # metric scalars
            ),
            in_specs=[pl.BlockSpec(memory_space=pltpu.MemorySpace.VMEM)
                      for _ in range(6)],
            out_specs=(
                pl.BlockSpec(memory_space=pltpu.MemorySpace.VMEM),
                pl.BlockSpec(memory_space=pltpu.MemorySpace.VMEM),
                pl.BlockSpec(memory_space=pltpu.MemorySpace.SMEM),
            ),
            compiler_params=pltpu.CompilerParams(
                vmem_limit_bytes=32 * 1024 * 1024),               # ample headroom everywhere
            cost_estimate=cost,
        )(x_pad, self.w_enc, self.b_enc, self.w_cat, self.b_cat, t_pad)

        recon = recon_pad[:b].astype(jnp.float32).reshape(x.shape)
        pred = logits_pad[:b, :self.num_classes]
        return recon, pred, metrics

    # ------------------------------- module-level API --------------------------------
    def forward(self, x):
        """Returns {RECON_X, PRED} like the PyTorch module (metrics epilogue skipped)."""
        b = x.shape[0]
        recon, pred, _ = self._fused_call(x, jnp.zeros((b,), jnp.int32),
                                          compute_cls=False)
        return {RECON_X: recon, PRED: pred}

    def training_step(self, x, target):
        """forward() + _calculate_metrics() fused into one kernel (GeneralAE.training_step)."""
        recon, pred, metrics = self._fused_call(x, target, compute_cls=True)
        forward_dict = {RECON_X: recon, PRED: pred, TARGET: target, X: x}
        metric_dict = {RECONSTRUCTION_LOSS: metrics[0],
                       CLASSIFICATION_LOSS: metrics[1],
                       LOSS: metrics[2],
                       ACC: metrics[3]}
        return forward_dict, metric_dict


# ------------------------------ pure-JAX reference ----------------------------------
def _reference(model, x, target):
    b = x.shape[0]
    xf = x.reshape(b, -1).astype(jnp.float32)
    z = jnp.maximum(jnp.dot(xf.astype(jnp.bfloat16), model.w_enc,
                            preferred_element_type=jnp.float32) + model.b_enc, 0.0)
    recon = jnp.tanh(jnp.dot(z.astype(jnp.bfloat16), model.w_dec,
                             preferred_element_type=jnp.float32) + model.b_dec)
    logits = (jnp.dot(z.astype(jnp.bfloat16), model.w_cls,
                      preferred_element_type=jnp.float32) + model.b_cls)[:, :model.num_classes]
    recon_loss = jnp.mean((recon - xf) ** 2)
    lse = jax.nn.logsumexp(logits, axis=1)
    picked = jnp.take_along_axis(logits, target[:, None].astype(jnp.int32), axis=1)[:, 0]
    ce = jnp.mean(lse - picked)
    acc = jnp.mean((jnp.argmax(logits, axis=1) == target).astype(jnp.float32))
    loss = recon_loss + jnp.where(jnp.isnan(ce), 0.0, ce)
    return recon.reshape(x.shape), logits, recon_loss, ce, loss, acc


# ------------------------------------ main -------------------------------------------
if __name__ == "__main__":
    key = jax.random.PRNGKey(0)
    kx, kt = jax.random.split(key)
    x = jax.random.uniform(kx, (BATCH, SEQ_LEN * CHANNELS, SPATIAL, SPATIAL),
                           jnp.float32, minval=-1.0, maxval=1.0)
    target = jax.random.randint(kt, (BATCH,), 0, NUM_CLASSES, jnp.int32)

    model = GeneralAE()
    forward_dict, metric_dict = model.training_step(x, target)

    jax.block_until_ready(forward_dict[RECON_X])
    jax.block_until_ready(forward_dict[PRED])
    jax.block_until_ready(metric_dict[LOSS])

    assert forward_dict[RECON_X].shape == x.shape
    assert forward_dict[PRED].shape == (BATCH, NUM_CLASSES)
    assert bool(jnp.isfinite(metric_dict[LOSS]))

    # forward-only path (classification-metrics epilogue statically skipped)
    fwd_only = model.forward(x)
    jax.block_until_ready(fwd_only[RECON_X])
    assert fwd_only[RECON_X].shape == x.shape

    # correctness vs. pure-JAX reference (same bf16 matmul operands, f32 accumulation)
    r_recon, r_logits, r_rl, r_ce, r_loss, r_acc = _reference(model, x, target)
    assert bool(jnp.allclose(forward_dict[RECON_X], r_recon, atol=1e-2, rtol=1e-2))
    assert bool(jnp.allclose(forward_dict[PRED], r_logits, atol=1e-2, rtol=1e-2))
    assert bool(jnp.allclose(metric_dict[RECONSTRUCTION_LOSS], r_rl, atol=1e-2, rtol=1e-2))
    assert bool(jnp.allclose(metric_dict[CLASSIFICATION_LOSS], r_ce, atol=1e-2, rtol=1e-2))
    assert bool(jnp.allclose(metric_dict[LOSS], r_loss, atol=1e-2, rtol=1e-2))
    assert bool(jnp.allclose(metric_dict[ACC], r_acc, atol=1e-3))

    print("KERNEL_OK")
</pallas_src>

<mosaic_0001>
module attributes {stable_mosaic.version = 11 : i64} {
  func.func @general_ae_kernel(%arg0: memref<8x1536xf32, #tpu.memory_space<vmem>>, %arg1: memref<1536x32xbf16, #tpu.memory_space<vmem>>, %arg2: memref<1x32xf32, #tpu.memory_space<vmem>>, %arg3: memref<32x1664xbf16, #tpu.memory_space<vmem>>, %arg4: memref<1x1664xf32, #tpu.memory_space<vmem>>, %arg5: memref<8x1xi32, #tpu.memory_space<vmem>>, %arg6: memref<8x1536xbf16, #tpu.memory_space<vmem>>, %arg7: memref<8x128xf32, #tpu.memory_space<vmem>>, %arg8: memref<4xf32, #tpu.memory_space<smem>>) attributes {dimension_semantics = [], scalar_prefetch = 0 : i64, scratch_operands = 0 : i64, tpu.core_type = #tpu.core_type<tc>} {
    %c0 = arith.constant 0 : index
    %c0_0 = arith.constant 0 : index
    %0 = vector.load %arg0[%c0, %c0_0] : memref<8x1536xf32, #tpu.memory_space<vmem>>, vector<8x1536xf32>
    %1 = arith.truncf %0 : vector<8x1536xf32> to vector<8x1536xbf16>
    %c0_1 = arith.constant 0 : index
    %c0_2 = arith.constant 0 : index
    %2 = vector.load %arg1[%c0_1, %c0_2] : memref<1536x32xbf16, #tpu.memory_space<vmem>>, vector<1536x32xbf16>
    %cst = arith.constant dense<0.000000e+00> : vector<8x32xf32>
    %3 = tpu.matmul %1, %2, %cst {dimension_numbers = #tpu.dot_dimension_numbers<[1], [0], [0], [1], [0, 0, 1, 1], [], []>} : vector<8x1536xbf16>, vector<1536x32xbf16>, vector<8x32xf32> -> vector<8x32xf32>
    %c0_3 = arith.constant 0 : index
    %c0_4 = arith.constant 0 : index
    %4 = vector.load %arg2[%c0_3, %c0_4] : memref<1x32xf32, #tpu.memory_space<vmem>>, vector<1x32xf32>
    %5 = vector.broadcast %4 : vector<1x32xf32> to vector<8x32xf32>
    %6 = arith.addf %3, %5 : vector<8x32xf32>
    %cst_5 = arith.constant 0.000000e+00 : f32
    %7 = vector.broadcast %cst_5 : f32 to vector<8x32xf32>
    %8 = arith.maximumf %6, %7 : vector<8x32xf32>
    %9 = arith.truncf %8 : vector<8x32xf32> to vector<8x32xbf16>
    %c0_6 = arith.constant 0 : index
    %c0_7 = arith.constant 0 : index
    %10 = vector.load %arg3[%c0_6, %c0_7] : memref<32x1664xbf16, #tpu.memory_space<vmem>>, vector<32x1664xbf16>
    %cst_8 = arith.constant dense<0.000000e+00> : vector<8x1664xf32>
    %11 = tpu.matmul %9, %10, %cst_8 {dimension_numbers = #tpu.dot_dimension_numbers<[1], [0], [0], [1], [0, 0, 1, 1], [], []>} : vector<8x32xbf16>, vector<32x1664xbf16>, vector<8x1664xf32> -> vector<8x1664xf32>
    %c0_9 = arith.constant 0 : index
    %c0_10 = arith.constant 0 : index
    %12 = vector.load %arg4[%c0_9, %c0_10] : memref<1x1664xf32, #tpu.memory_space<vmem>>, vector<1x1664xf32>
    %13 = vector.broadcast %12 : vector<1x1664xf32> to vector<8x1664xf32>
    %14 = arith.addf %11, %13 : vector<8x1664xf32>
    %15 = vector.extract_strided_slice %14 {offsets = [0, 0], sizes = [8, 1536], strides = [1, 1]} : vector<8x1664xf32> to vector<8x1536xf32>
    %16 = math.tanh %15 : vector<8x1536xf32>
    %17 = vector.extract_strided_slice %14 {offsets = [0, 1536], sizes = [8, 128], strides = [1, 1]} : vector<8x1664xf32> to vector<8x128xf32>
    %18 = arith.truncf %16 : vector<8x1536xf32> to vector<8x1536xbf16>
    %c0_11 = arith.constant 0 : index
    %c0_12 = arith.constant 0 : index
    %19 = vector.load %arg6[%c0_11, %c0_12] : memref<8x1536xbf16, #tpu.memory_space<vmem>>, vector<8x1536xbf16>
    tpu.vector_store %arg6[%c0_11, %c0_12], %18 {strides = array<i32>} : memref<8x1536xbf16, #tpu.memory_space<vmem>>, vector<8x1536xbf16>,
    %c0_13 = arith.constant 0 : index
    %c0_14 = arith.constant 0 : index
    %20 = vector.load %arg7[%c0_13, %c0_14] : memref<8x128xf32, #tpu.memory_space<vmem>>, vector<8x128xf32>
    tpu.vector_store %arg7[%c0_13, %c0_14], %17 {strides = array<i32>} : memref<8x128xf32, #tpu.memory_space<vmem>>, vector<8x128xf32>,
    %21 = vector.extract_strided_slice %16 {offsets = [0, 0], sizes = [2, 1536], strides = [1, 1]} : vector<8x1536xf32> to vector<2x1536xf32>
    %22 = vector.extract_strided_slice %0 {offsets = [0, 0], sizes = [2, 1536], strides = [1, 1]} : vector<8x1536xf32> to vector<2x1536xf32>
    %23 = arith.subf %21, %22 : vector<2x1536xf32>
    %24 = arith.mulf %23, %23 : vector<2x1536xf32>
    %25 = vector.shape_cast %24 : vector<2x1536xf32> to vector<1x2x1536xf32>
    %cst_15 = arith.constant dense<0.000000e+00> : vector<1xf32>
    %26 = vector.multi_reduction <add>, %25, %cst_15 [1, 2] : vector<1x2x1536xf32> to vector<1xf32>
    %27 = vector.shape_cast %26 : vector<1xf32> to vector<1x1x1xf32>
    %28 = vector.extract %27[0, 0, 0] : f32 from vector<1x1x1xf32>
    %cst_16 = arith.constant 3.072000e+03 : f32
    %29 = arith.divf %28, %cst_16 : f32
    %c0_17 = arith.constant 0 : index
    %30 = memref.load %arg8[%c0_17] : memref<4xf32, #tpu.memory_space<smem>>
    memref.store %29, %arg8[%c0_17] : memref<4xf32, #tpu.memory_space<smem>>
    %31 = vector.extract_strided_slice %17 {offsets = [0, 0], sizes = [2, 128], strides = [1, 1]} : vector<8x128xf32> to vector<2x128xf32>
    %c0_18 = arith.constant 0 : index
    %c0_19 = arith.constant 0 : index
    %32 = vector.load %arg5[%c0_18, %c0_19] : memref<8x1xi32, #tpu.memory_space<vmem>>, vector<8x1xi32>
    %33 = vector.extract_strided_slice %32 {offsets = [0, 0], sizes = [2, 1], strides = [1, 1]} : vector<8x1xi32> to vector<2x1xi32>
    %34 = tpu.iota {dimensions = array<i32: 1>} : vector<2x128xi32>
    %c4_i32 = arith.constant 4 : i32
    %35 = vector.broadcast %c4_i32 : i32 to vector<2x128xi32>
    %36 = arith.cmpi slt, %34, %35 : vector<2x128xi32>
    %cst_20 = arith.constant -1.000000e+30 : f32
    %37 = vector.broadcast %cst_20 : f32 to vector<2x128xf32>
    %38 = arith.select %36, %31, %37 : vector<2x128xi1>, vector<2x128xf32>
    %cst_21 = arith.constant dense<0xFF800000> : vector<2xf32>
    %39 = vector.multi_reduction <maximumf>, %38, %cst_21 [1] : vector<2x128xf32> to vector<2xf32>
    %40 = vector.shape_cast %39 : vector<2xf32> to vector<2x1xf32>
    %41 = vector.broadcast %40 : vector<2x1xf32> to vector<2x128xf32>
    %42 = arith.subf %38, %41 : vector<2x128xf32>
    %43 = math.exp %42 : vector<2x128xf32>
    %cst_22 = arith.constant 0.000000e+00 : f32
    %44 = vector.broadcast %cst_22 : f32 to vector<2x128xf32>
    %45 = arith.select %36, %43, %44 : vector<2x128xi1>, vector<2x128xf32>
    %cst_23 = arith.constant dense<0.000000e+00> : vector<2xf32>
    %46 = vector.multi_reduction <add>, %45, %cst_23 [1] : vector<2x128xf32> to vector<2xf32>
    %47 = vector.shape_cast %46 : vector<2xf32> to vector<2x1xf32>
    %48 = math.log %47 : vector<2x1xf32>
    %49 = arith.addf %48, %40 : vector<2x1xf32>
    %50 = vector.broadcast %33 : vector<2x1xi32> to vector<2x128xi32>
    %51 = arith.cmpi eq, %34, %50 : vector<2x128xi32>
    %52 = arith.andi %51, %36 : vector<2x128xi1>
    %53 = arith.extui %52 : vector<2x128xi1> to vector<2x128xi32>
    %54 = arith.sitofp %53 : vector<2x128xi32> to vector<2x128xf32>
    %55 = arith.mulf %31, %54 : vector<2x128xf32>
    %cst_24 = arith.constant dense<0.000000e+00> : vector<2xf32>
    %56 = vector.multi_reduction <add>, %55, %cst_24 [1] : vector<2x128xf32> to vector<2xf32>
    %57 = vector.shape_cast %56 : vector<2xf32> to vector<2x1xf32>
    %58 = arith.subf %49, %57 : vector<2x1xf32>
    %59 = vector.shape_cast %58 : vector<2x1xf32> to vector<1x2x1xf32>
    %cst_25 = arith.constant dense<0.000000e+00> : vector<1xf32>
    %60 = vector.multi_reduction <add>, %59, %cst_25 [1, 2] : vector<1x2x1xf32> to vector<1xf32>
    %61 = vector.shape_cast %60 : vector<1xf32> to vector<1x1x1xf32>
    %62 = vector.extract %61[0, 0, 0] : f32 from vector<1x1x1xf32>
    %cst_26 = arith.constant 2.000000e+00 : f32
    %63 = arith.divf %62, %cst_26 : f32
    %64 = vector.broadcast %40 : vector<2x1xf32> to vector<2x128xf32>
    %65 = arith.cmpf oeq, %38, %64 : vector<2x128xf32>
    %c128_i32 = arith.constant 128 : i32
    %66 = vector.broadcast %c128_i32 : i32 to vector<2x128xi32>
    %67 = arith.select %65, %34, %66 : vector<2x128xi1>, vector<2x128xi32>
    %cst_27 = arith.constant dense<2147483647> : vector<2xi32>
    %68 = vector.multi_reduction <minsi>, %67, %cst_27 [1] : vector<2x128xi32> to vector<2xi32>
    %69 = vector.shape_cast %68 : vector<2xi32> to vector<2x1xi32>
    %70 = arith.cmpi eq, %69, %33 : vector<2x1xi32>
    %71 = arith.extui %70 : vector<2x1xi1> to vector<2x1xi32>
    %72 = arith.sitofp %71 : vector<2x1xi32> to vector<2x1xf32>
    %73 = vector.shape_cast %72 : vector<2x1xf32> to vector<1x2x1xf32>
    %cst_28 = arith.constant dense<0.000000e+00> : vector<1xf32>
    %74 = vector.multi_reduction <add>, %73, %cst_28 [1, 2] : vector<1x2x1xf32> to vector<1xf32>
    %75 = vector.shape_cast %74 : vector<1xf32> to vector<1x1x1xf32>
    %76 = vector.extract %75[0, 0, 0] : f32 from vector<1x1x1xf32>
    %cst_29 = arith.constant 2.000000e+00 : f32
    %77 = arith.divf %76, %cst_29 : f32
    %78 = arith.cmpf one, %63, %63 : f32
    %cst_30 = arith.constant 0.000000e+00 : f32
    %79 = arith.select %78, %cst_30, %63 : f32
    %80 = arith.addf %29, %79 : f32
    %c1 = arith.constant 1 : index
    %81 = memref.load %arg8[%c1] : memref<4xf32, #tpu.memory_space<smem>>
    memref.store %63, %arg8[%c1] : memref<4xf32, #tpu.memory_space<smem>>
    %c2 = arith.constant 2 : index
    %82 = memref.load %arg8[%c2] : memref<4xf32, #tpu.memory_space<smem>>
    memref.store %80, %arg8[%c2] : memref<4xf32, #tpu.memory_space<smem>>
    %c3 = arith.constant 3 : index
    %83 = memref.load %arg8[%c3] : memref<4xf32, #tpu.memory_space<smem>>
    memref.store %77, %arg8[%c3] : memref<4xf32, #tpu.memory_space<smem>>
    return
  }
}

</mosaic_0001>

<bundles_post_ra>
// kernel: tpu_custom_call.1
= control target key start
LH: loop header
LB: loop body
LE: loop exit
PB: predicated region body
PF: predicated region fallthrough
CT: control target
= control target key end

     0   :  { %14 = vsyncpa [#allocation3], 0  ;;  %s2976_s0 = inlined_call_operand.vmem [shape: f32[8,1536], index: 0, kind: input, shape index: {}]   ;;  %s2977_s1 = inlined_call_operand.vmem [shape: bf16[1536,32], index: 1, kind: input, shape index: {}]   ;;  %s2978_s2 = inlined_call_operand.vmem [shape: f32[1,32], index: 2, kind: input, shape index: {}]   ;;  %s2979_s3 = inlined_call_operand.vmem [shape: bf16[32,1664], index: 3, kind: input, shape index: {}]   ;;  %s2980_s4 = inlined_call_operand.vmem [shape: f32[1,1664], index: 4, kind: input, shape index: {}]   ;;  %s2981_s5 = inlined_call_operand.vmem [shape: s32[8,1], index: 5, kind: input, shape index: {}]   ;;  %s2982_s6 = inlined_call_operand.hbm [shape: bf16[8,1536], index: 6, kind: output, shape index: {0}]   ;;  %s2983_s7 = inlined_call_operand.hbm [shape: f32[8,128], index: 7, kind: output, shape index: {1}]   ;;  %s2984_s8 = inlined_call_operand.hbm [shape: f32[4], index: 8, kind: output, shape index: {2}]  }
   0x1   :  { %15 = vsyncpa [#allocation6], 0  ;;  %v2147_v0 = vld [vmem:[%s2977_s1 + $0x78] sm:$0xff]   ;;  %v2151_v4 = vld [vmem:[%s2977_s1 + $0x70] sm:$0xff]  }
   0x2   :  { %v2148_v1 = vld [vmem:[%s2977_s1 + $0xf8] sm:$0xff]   ;;  %1990 = vmatprep.subr.bf16.mxu0 %v2147_v0  ;;  %v2152_v5 = vld [vmem:[%s2977_s1 + $0xf0] sm:$0xff]   ;;  %v2155_v8 = vld [vmem:[%s2977_s1 + $0x68] sm:$0xff]  }
   0x3   :  { %v2149_v2 = vld [vmem:[%s2977_s1 + $0x38] sm:$0xff]   ;;  %2012 = vmatprep.subr.bf16.mxu1 %v2148_v1  ;;  %v2153_v6 = vld [vmem:[%s2977_s1 + $0x30] sm:$0xff]   ;;  %v2156_v9 = vld [vmem:[%s2977_s1 + $0xe8] sm:$0xff]  }
   0x4   :  { %v2150_v3 = vld [vmem:[%s2977_s1 + $0xb8] sm:$0xff]   ;;  %1991 = vmatpush3.bf16.msra.mxu0 %v2149_v2  ;;  %v2154_v7 = vld [vmem:[%s2977_s1 + $0xb0] sm:$0xff]   ;;  %v2157_v10 = vld [vmem:[%s2977_s1 + $0x28] sm:$0xff]  }
   0x5   :  { %2013 = vmatpush3.bf16.msra.mxu1 %v2150_v3  ;;  %1992 = vmatprep.subr.bf16.mxu0 %v2151_v4  ;;  %v2158_v11 = vld [vmem:[%s2977_s1 + $0xa8] sm:$0xff]   ;;  %v2159_v12 = vld [vmem:[%s2977_s1 + $0x60] sm:$0xff]   ;;  %v2163_v16 = vld [vmem:[%s2977_s1 + $0x58] sm:$0xff]  }
   0x6   :  { %2014 = vmatprep.subr.bf16.mxu1 %v2152_v5  ;;  %v2160_v13 = vld [vmem:[%s2977_s1 + $0xe0] sm:$0xff]   ;;  %v2164_v17 = vld [vmem:[%s2977_s1 + $0xd8] sm:$0xff]   ;;  %v2167_v20 = vld [vmem:[%s2977_s1 + $0x50] sm:$0xff]  }
   0x7   :  { %v2161_v14 = vld [vmem:[%s2977_s1 + $0x20] sm:$0xff]   ;;  %v2165_v18 = vld [vmem:[%s2977_s1 + $0x18] sm:$0xff]   ;;  %v2168_v21 = vld [vmem:[%s2977_s1 + $0xd0] sm:$0xff]  }
   0x8   :  { %1993 = vmatpush3.bf16.msra.mxu0 %v2153_v6  ;;  %v2162_v15 = vld [vmem:[%s2977_s1 + $0xa0] sm:$0xff]   ;;  %v2166_v19 = vld [vmem:[%s2977_s1 + $0x98] sm:$0xff]   ;;  %v2169_v22 = vld [vmem:[%s2977_s1 + $0x10] sm:$0xff]  }
   0x9   :  { %2015 = vmatpush3.bf16.msra.mxu1 %v2154_v7  ;;  %1994 = vmatprep.subr.bf16.mxu0 %v2155_v8  ;;  %v2170_v23 = vld [vmem:[%s2977_s1 + $0x90] sm:$0xff]   ;;  %v2171_v24 = vld [vmem:[%s2977_s1 + $0x48] sm:$0xff]   ;;  %v2175_v28 = vld [vmem:[%s2977_s1 + $0x40] sm:$0xff]  }
   0xa   :  { %2016 = vmatprep.subr.bf16.mxu1 %v2156_v9  ;;  %v2172_v25 = vld [vmem:[%s2977_s1 + $0xc8] sm:$0xff]   ;;  %v2176_v29 = vld [vmem:[%s2977_s1 + $0xc0] sm:$0xff]   ;;  %v2518_v33 = vld [vmem:[%s2976_s0 + $0x18] sm:$0xff] }
   0xb   :  { %v2173_v26 = vld [vmem:[%s2977_s1 + $0x8] sm:$0xff]   ;;  %v2177_v30 = vld [vmem:[%s2977_s1] sm:$0xff]   ;;  %v45_v36 = vpack.c.bf16 %v2518_v33, %v2518_v33  ;;  %v2534_v38 = vld [vmem:[%s2976_s0 + $0x10] sm:$0xff] }
   0xc   :  { %1995 = vmatpush3.bf16.msra.mxu0 %v2157_v10  ;;  %v2174_v27 = vld [vmem:[%s2977_s1 + $0x88] sm:$0xff]   ;;  %v2178_v31 = vld [vmem:[%s2977_s1 + $0x80] sm:$0xff]   ;;  %v44_v39 = vpack.c.bf16 %v2534_v38, %v2534_v38  ;;  %v2179_v40 = vld [vmem:[%s2977_s1 + $0x178] sm:$0xff]  }
   0xd   :  { %2017 = vmatpush3.bf16.msra.mxu1 %v2158_v11  ;;  %1996 = vmatprep.subr.bf16.mxu0 %v2159_v12  ;;  %v2513_v32 = vld [vmem:[%s2976_s0 + $0x8] sm:$0xff]  ;;  %v2523_v34 = vld [vmem:[%s2976_s0] sm:$0xff]  ;;  %v2180_v41 = vld [vmem:[%s2977_s1 + $0x1f8] sm:$0xff]  }
   0xe   :  { %2018 = vmatprep.subr.bf16.mxu1 %v2160_v13  ;;  %v43_v35 = vpack.c.bf16 %v2513_v32, %v2513_v32  ;;  %v42_v37 = vpack.c.bf16 %v2523_v34, %v2523_v34  ;;  %901 = vmatprep.mubr.bf16.mxu1 %v45_v36  ;;  %v2181_v42 = vld [vmem:[%s2977_s1 + $0x138] sm:$0xff]   ;;  %v2183_v44 = vld [vmem:[%s2977_s1 + $0x170] sm:$0xff]   ;;  %v2187_v48 = vld [vmem:[%s2977_s1 + $0x168] sm:$0xff]  }
   0xf   :  { %v2182_v43 = vld [vmem:[%s2977_s1 + $0x1b8] sm:$0xff]   ;;  %v2184_v45 = vld [vmem:[%s2977_s1 + $0x1f0] sm:$0xff]   ;;  %v2188_v49 = vld [vmem:[%s2977_s1 + $0x1e8] sm:$0xff]  }
  0x10   :  { %1997 = vmatpush3.bf16.msra.mxu0 %v2161_v14  ;;  %861 = vmatprep.mubr.bf16.mxu0 %v43_v35  ;;  %v2185_v46 = vld [vmem:[%s2977_s1 + $0x130] sm:$0xff]   ;;  %v2189_v50 = vld [vmem:[%s2977_s1 + $0x128] sm:$0xff]   ;;  %v2191_v52 = vld [vmem:[%s2977_s1 + $0x160] sm:$0xff]  }
  0x11   :  { %2019 = vmatpush3.bf16.msra.mxu1 %v2162_v15  ;;  %1998 = vmatprep.subr.bf16.mxu0 %v2163_v16  ;;  %v2186_v47 = vld [vmem:[%s2977_s1 + $0x1b0] sm:$0xff]   ;;  %v2190_v51 = vld [vmem:[%s2977_s1 + $0x1a8] sm:$0xff]   ;;  %v2192_v53 = vld [vmem:[%s2977_s1 + $0x1e0] sm:$0xff]  }
  0x12   :  { %2020 = vmatprep.subr.bf16.mxu1 %v2164_v17  ;;  %v2193_v54 = vld [vmem:[%s2977_s1 + $0x120] sm:$0xff]   ;;  %v2195_v56 = vld [vmem:[%s2977_s1 + $0x158] sm:$0xff]   ;;  %v2199_v60 = vld [vmem:[%s2977_s1 + $0x150] sm:$0xff]  }
  0x13   :  { %v2194_v55 = vld [vmem:[%s2977_s1 + $0x1a0] sm:$0xff]   ;;  %v2196_v57 = vld [vmem:[%s2977_s1 + $0x1d8] sm:$0xff]   ;;  %v2200_v61 = vld [vmem:[%s2977_s1 + $0x1d0] sm:$0xff]  }
  0x14   :  { %1999 = vmatpush3.bf16.msra.mxu0 %v2165_v18  ;;  %v2197_v58 = vld [vmem:[%s2977_s1 + $0x118] sm:$0xff]   ;;  %v2201_v62 = vld [vmem:[%s2977_s1 + $0x110] sm:$0xff]   ;;  %v2203_v0 = vld [vmem:[%s2977_s1 + $0x148] sm:$0xff]  }
  0x15   :  { %2021 = vmatpush3.bf16.msra.mxu1 %v2166_v19  ;;  %2000 = vmatprep.subr.bf16.mxu0 %v2167_v20  ;;  %v2198_v59 = vld [vmem:[%s2977_s1 + $0x198] sm:$0xff]   ;;  %v2202_v63 = vld [vmem:[%s2977_s1 + $0x190] sm:$0xff]   ;;  %v2204_v1 = vld [vmem:[%s2977_s1 + $0x1c8] sm:$0xff]  }
  0x16   :  { %2022 = vmatprep.subr.bf16.mxu1 %v2168_v21  ;;  %v2205_v2 = vld [vmem:[%s2977_s1 + $0x108] sm:$0xff]   ;;  %v2207_v4 = vld [vmem:[%s2977_s1 + $0x140] sm:$0xff]   ;;  %v2642_v9 = vld [vmem:[%s2976_s0 + $0x38] sm:$0xff] }
  0x17   :  { %v2206_v3 = vld [vmem:[%s2977_s1 + $0x188] sm:$0xff]   ;;  %v2208_v5 = vld [vmem:[%s2977_s1 + $0x1c0] sm:$0xff]   ;;  %v49_v11 = vpack.c.bf16 %v2642_v9, %v2642_v9  ;;  %v2656_v13 = vld [vmem:[%s2976_s0 + $0x30] sm:$0xff] }
  0x18   :  { %2001 = vmatpush3.bf16.msra.mxu0 %v2169_v22  ;;  %v2209_v6 = vld [vmem:[%s2977_s1 + $0x100] sm:$0xff]   ;;  %v2637_v8 = vld [vmem:[%s2976_s0 + $0x28] sm:$0xff]  ;;  %v48_v15 = vpack.c.bf16 %v2656_v13, %v2656_v13  ;;  %v2211_v16 = vld [vmem:[%s2977_s1 + $0x278] sm:$0xff]  }
  0x19   :  { %2023 = vmatpush3.bf16.msra.mxu1 %v2170_v23  ;;  %2002 = vmatprep.subr.bf16.mxu0 %v2171_v24  ;;  %v2210_v7 = vld [vmem:[%s2977_s1 + $0x180] sm:$0xff]   ;;  %v47_v10 = vpack.c.bf16 %v2637_v8, %v2637_v8  ;;  %v2212_v17 = vld [vmem:[%s2977_s1 + $0x2f8] sm:$0xff]   ;;  %v2215_v20 = vld [vmem:[%s2977_s1 + $0x270] sm:$0xff]  }
  0x1a   :  { %2024 = vmatprep.subr.bf16.mxu1 %v2172_v25  ;;  %v2651_v12 = vld [vmem:[%s2976_s0 + $0x20] sm:$0xff]  ;;  %v2213_v18 = vld [vmem:[%s2977_s1 + $0x238] sm:$0xff]   ;;  %v2216_v21 = vld [vmem:[%s2977_s1 + $0x2f0] sm:$0xff]  }
  0x1b   :  { %v46_v14 = vpack.c.bf16 %v2651_v12, %v2651_v12  ;;  %v2214_v19 = vld [vmem:[%s2977_s1 + $0x2b8] sm:$0xff]   ;;  %v2217_v22 = vld [vmem:[%s2977_s1 + $0x230] sm:$0xff]   ;;  %v2219_v24 = vld [vmem:[%s2977_s1 + $0x268] sm:$0xff]  }
  0x1c   :  { %2003 = vmatpush3.bf16.msra.mxu0 %v2173_v26  ;;  %v2218_v23 = vld [vmem:[%s2977_s1 + $0x2b0] sm:$0xff]   ;;  %v2220_v25 = vld [vmem:[%s2977_s1 + $0x2e8] sm:$0xff]   ;;  %v2227_v35 = vld [vmem:[%s2977_s1 + $0x258] sm:$0xff]  }
  0x1d   :  { %2025 = vmatpush3.bf16.msra.mxu1 %v2174_v27  ;;  %2004 = vmatprep.subr.bf16.mxu0 %v2175_v28  ;;  %v2221_v26 = vld [vmem:[%s2977_s1 + $0x228] sm:$0xff]   ;;  %v2223_v28 = vld [vmem:[%s2977_s1 + $0x260] sm:$0xff]   ;;  %v2228_v36 = vld [vmem:[%s2977_s1 + $0x2d8] sm:$0xff]  }
  0x1e   :  { %2026 = vmatprep.subr.bf16.mxu1 %v2176_v29  ;;  %v2222_v27 = vld [vmem:[%s2977_s1 + $0x2a8] sm:$0xff]   ;;  %v2224_v29 = vld [vmem:[%s2977_s1 + $0x2e0] sm:$0xff]  }
  0x20   :  { %2005 = vmatpush3.bf16.msra.mxu0 %v2177_v30  ;;  %v2225_v30 = vld [vmem:[%s2977_s1 + $0x220] sm:$0xff]  }
  0x21   :  { %2027 = vmatpush3.bf16.msra.mxu1 %v2178_v31  ;;  %2034 = vmatprep.subr.bf16.mxu0 %v2179_v40  ;;  %v2226_v31 = vld [vmem:[%s2977_s1 + $0x2a0] sm:$0xff]   ;;  %v2231_v40 = vld [vmem:[%s2977_s1 + $0x250] sm:$0xff]  }
  0x22   :  { %2056 = vmatprep.subr.bf16.mxu1 %v2180_v41  ;;  %v2232_v41 = vld [vmem:[%s2977_s1 + $0x2d0] sm:$0xff]  }
  0x23   :  { %862 = vmatmul.mubr.bf16.vlgmr.msra.gmra.mxu0 %v42_v37  ;;  %v2229_v37 = vld [vmem:[%s2977_s1 + $0x218] sm:$0xff]  }
  0x24   :  { %902 = vmatmul.mubr.bf16.vlgmr.msra.gmra.mxu1 %v44_v39  ;;  %2035 = vmatpush3.bf16.msra.mxu0 %v2181_v42  ;;  %v2230_v39 = vld [vmem:[%s2977_s1 + $0x298] sm:$0xff]   ;;  %v2233_v42 = vld [vmem:[%s2977_s1 + $0x210] sm:$0xff]  }
  0x25   :  { %2057 = vmatpush3.bf16.msra.mxu1 %v2182_v43  ;;  %2036 = vmatprep.subr.bf16.mxu0 %v2183_v44  ;;  %v2234_v43 = vld [vmem:[%s2977_s1 + $0x290] sm:$0xff]   ;;  %v2235_v44 = vld [vmem:[%s2977_s1 + $0x248] sm:$0xff]  }
  0x26   :  { %2058 = vmatprep.subr.bf16.mxu1 %v2184_v45  ;;  %941 = vmatprep.mubr.bf16.mxu0 %v47_v10  ;;  %v2236_v45 = vld [vmem:[%s2977_s1 + $0x2c8] sm:$0xff]  }
  0x27   :  { %981 = vmatprep.mubr.bf16.mxu1 %v49_v11 }
  0x28   :  { %2037 = vmatpush3.bf16.msra.mxu0 %v2185_v46  ;;  %v2237_v46 = vld [vmem:[%s2977_s1 + $0x208] sm:$0xff]  }
  0x29   :  { %2059 = vmatpush3.bf16.msra.mxu1 %v2186_v47  ;;  %2038 = vmatprep.subr.bf16.mxu0 %v2187_v48  ;;  %v2238_v47 = vld [vmem:[%s2977_s1 + $0x288] sm:$0xff]   ;;  %v2239_v48 = vld [vmem:[%s2977_s1 + $0x240] sm:$0xff]  }
  0x2a   :  { %2060 = vmatprep.subr.bf16.mxu1 %v2188_v49  ;;  %v2240_v49 = vld [vmem:[%s2977_s1 + $0x2c0] sm:$0xff]  }
  0x2c   :  { %2039 = vmatpush3.bf16.msra.mxu0 %v2189_v50  ;;  %v2241_v50 = vld [vmem:[%s2977_s1 + $0x200] sm:$0xff]  }
  0x2d   :  { %2061 = vmatpush3.bf16.msra.mxu1 %v2190_v51  ;;  %2040 = vmatprep.subr.bf16.mxu0 %v2191_v52  ;;  %v2242_v51 = vld [vmem:[%s2977_s1 + $0x280] sm:$0xff]   ;;  %v2761_v52 = vld [vmem:[%s2976_s0 + $0x48] sm:$0xff] }
  0x2e   :  { %2062 = vmatprep.subr.bf16.mxu1 %v2192_v53  ;;  %v51_v53 = vpack.c.bf16 %v2761_v52, %v2761_v52 }
  0x30   :  { %2041 = vmatpush3.bf16.msra.mxu0 %v2193_v54  ;;  %v2768_v54 = vld [vmem:[%s2976_s0 + $0x58] sm:$0xff] }
  0x31   :  { %2063 = vmatpush3.bf16.msra.mxu1 %v2194_v55  ;;  %2042 = vmatprep.subr.bf16.mxu0 %v2195_v56  ;;  %v2773_v55 = vld [vmem:[%s2976_s0 + $0x40] sm:$0xff]  ;;  %v2778_v56 = vld [vmem:[%s2976_s0 + $0x50] sm:$0xff] }
  0x32   :  { %2064 = vmatprep.subr.bf16.mxu1 %v2196_v57  ;;  %v53_v57 = vpack.c.bf16 %v2768_v54, %v2768_v54 }
  0x34   :  { %2043 = vmatpush3.bf16.msra.mxu0 %v2197_v58  ;;  %v50_v58 = vpack.c.bf16 %v2773_v55, %v2773_v55 }
  0x35   :  { %2065 = vmatpush3.bf16.msra.mxu1 %v2198_v59  ;;  %2044 = vmatprep.subr.bf16.mxu0 %v2199_v60  ;;  %v52_v59 = vpack.c.bf16 %v2778_v56, %v2778_v56 }
  0x36   :  { %2066 = vmatprep.subr.bf16.mxu1 %v2200_v61 }
  0x38   :  { %2045 = vmatpush3.bf16.msra.mxu0 %v2201_v62 }
  0x39   :  { %2067 = vmatpush3.bf16.msra.mxu1 %v2202_v63  ;;  %2046 = vmatprep.subr.bf16.mxu0 %v2203_v0 }
  0x3a   :  { %2068 = vmatprep.subr.bf16.mxu1 %v2204_v1 }
  0x3c   :  { %2047 = vmatpush3.bf16.msra.mxu0 %v2205_v2 }
  0x3d   :  { %2069 = vmatpush3.bf16.msra.mxu1 %v2206_v3  ;;  %2048 = vmatprep.subr.bf16.mxu0 %v2207_v4 }
  0x3e   :  { %2070 = vmatprep.subr.bf16.mxu1 %v2208_v5 }
  0x40   :  { %2049 = vmatpush3.bf16.msra.mxu0 %v2209_v6 }
  0x41   :  { %2071 = vmatpush3.bf16.msra.mxu1 %v2210_v7  ;;  %2078 = vmatprep.subr.bf16.mxu0 %v2211_v16 }
  0x42   :  { %2100 = vmatprep.subr.bf16.mxu1 %v2212_v17 }
  0x43   :  { %942 = vmatmul.mubr.bf16.vlgmr.msra.gmra.mxu0 %v46_v14 }
  0x44   :  { %982 = vmatmul.mubr.bf16.vlgmr.msra.gmra.mxu1 %v48_v15  ;;  %2079 = vmatpush3.bf16.msra.mxu0 %v2213_v18 }
  0x45   :  { %2101 = vmatpush3.bf16.msra.mxu1 %v2214_v19  ;;  %2080 = vmatprep.subr.bf16.mxu0 %v2215_v20 }
  0x46   :  { %2102 = vmatprep.subr.bf16.mxu1 %v2216_v21  ;;  %1021 = vmatprep.mubr.bf16.mxu0 %v51_v53 }
  0x47   :  { %1061 = vmatprep.mubr.bf16.mxu1 %v53_v57 }
  0x48   :  { %2081 = vmatpush3.bf16.msra.mxu0 %v2217_v22 }
  0x49   :  { %2103 = vmatpush3.bf16.msra.mxu1 %v2218_v23  ;;  %2082 = vmatprep.subr.bf16.mxu0 %v2219_v24 }
  0x4a   :  { %2104 = vmatprep.subr.bf16.mxu1 %v2220_v25 }
  0x4c   :  { %2083 = vmatpush3.bf16.msra.mxu0 %v2221_v26 }
  0x4d   :  { %2105 = vmatpush3.bf16.msra.mxu1 %v2222_v27  ;;  %2084 = vmatprep.subr.bf16.mxu0 %v2223_v28 }
  0x4e   :  { %2106 = vmatprep.subr.bf16.mxu1 %v2224_v29 }
  0x50   :  { %2085 = vmatpush3.bf16.msra.mxu0 %v2225_v30 }
  0x51   :  { %2107 = vmatpush3.bf16.msra.mxu1 %v2226_v31  ;;  %2086 = vmatprep.subr.bf16.mxu0 %v2227_v35 }
  0x52   :  { %2108 = vmatprep.subr.bf16.mxu1 %v2228_v36 }
  0x54   :  { %2087 = vmatpush3.bf16.msra.mxu0 %v2229_v37 }
  0x55   :  { %2109 = vmatpush3.bf16.msra.mxu1 %v2230_v39  ;;  %2088 = vmatprep.subr.bf16.mxu0 %v2231_v40 }
  0x56   :  { %2110 = vmatprep.subr.bf16.mxu1 %v2232_v41 }
  0x58   :  { %2089 = vmatpush3.bf16.msra.mxu0 %v2233_v42 }
  0x59   :  { %2111 = vmatpush3.bf16.msra.mxu1 %v2234_v43  ;;  %2090 = vmatprep.subr.bf16.mxu0 %v2235_v44 }
  0x5a   :  { %2112 = vmatprep.subr.bf16.mxu1 %v2236_v45 }
  0x5c   :  { %2091 = vmatpush3.bf16.msra.mxu0 %v2237_v46 }
  0x5d   :  { %2113 = vmatpush3.bf16.msra.mxu1 %v2238_v47  ;;  %2092 = vmatprep.subr.bf16.mxu0 %v2239_v48 }
  0x5e   :  { %2114 = vmatprep.subr.bf16.mxu1 %v2240_v49 }
  0x60   :  { %2093 = vmatpush3.bf16.msra.mxu0 %v2241_v50 }
  0x61   :  { %2115 = vmatpush3.bf16.msra.mxu1 %v2242_v51 }
  0x63   :  { %1022 = vmatmul.mubr.bf16.vlgmr.msra.gmra.mxu0 %v50_v58 }
  0x64   :  { %1062 = vmatmul.mubr.bf16.vlgmr.msra.gmra.mxu1 %v52_v59 }
  0x65   :  { %16 = vsyncpa [#allocation4], 0  ;;  %v2245_v60 = vld [vmem:[%s2979_s3 + $0x6c] ss:$52 sps:$4 sm:$0xff]   ;;  %v2248_v61 = vld [vmem:[%s2979_s3 + $0x74] ss:$52 sps:$4 sm:$0xff]  }
  0x66   :  { %v2243_v62 = vld [vmem:[%s2979_s3 + $0x68] ss:$52 sps:$4 sm:$0xff]   ;;  %v2246_v63 = vld [vmem:[%s2979_s3 + $0x70] ss:$52 sps:$4 sm:$0xff]   ;;  %1316 = vmatprep.subr.bf16.mxu0 %v2245_v60  ;;  %1357 = vmatprep.subr.bf16.mxu1 %v2248_v61  ;;  %v2254_v1 = vld [vmem:[%s2979_s3 + $0xc] ss:$52 sps:$4 sm:$0xff]  }
  0x67   :  { %1317 = vmatpush1.bf16.msra.mxu0 %v2243_v62  ;;  %1358 = vmatpush1.bf16.msra.mxu1 %v2246_v63  ;;  %v2251_v0 = vld [vmem:[%s2979_s3 + $0x4] ss:$52 sps:$4 sm:$0xff]   ;;  %v2249_v2 = vld [vmem:[%s2979_s3] ss:$52 sps:$4 sm:$0xff]   ;;  %v2252_v3 = vld [vmem:[%s2979_s3 + $0x8] ss:$52 sps:$4 sm:$0xff]  }
  0x68   :  { %1318 = vmatprep.subr.bf16.mxu0 %v2251_v0  ;;  %1359 = vmatprep.subr.bf16.mxu1 %v2254_v1  ;;  %v2257_v4 = vld [vmem:[%s2979_s3 + $0x7c] ss:$52 sps:$4 sm:$0xff]   ;;  %v2363_v5 = vmov 0   ;;  %v2260_v6 = vld [vmem:[%s2979_s3 + $0x84] ss:$52 sps:$4 sm:$0xff]   ;;  %vm1300_vm0 = vcmask 261120  }
  0x69   :  { %1336 = vmatprep.mubr.bf16.mxu0 %v2363_v5  ;;  %1377 = vmatprep.mubr.bf16.mxu1 %v2363_v5  ;;  %v2823_v7 = vld [vmem:[%s2981_s5] sm:$0xff]  ;;  %v2255_v58 = vld [vmem:[%s2979_s3 + $0x78] ss:$52 sps:$4 sm:$0xff]   ;;  %v2263_v61 = vld [vmem:[%s2979_s3 + $0x14] ss:$52 sps:$4 sm:$0xff]   ;;  %vm2365_vm1 = vmmov 0  }
  0x6a   :  { %2145 = vset.pattern.permute.xlu1 %v2363_v5  ;;  %2146 = vset.pattern.permute.xlu0 %v2363_v5  ;;  %v1846_v29 = vld [vmem:[%s2978_s2] ss:$0 sm:$0xff]  ;;  %v2266_v62 = vld [vmem:[%s2979_s3 + $0x1c] ss:$52 sps:$4 sm:$0xff]   ;;  %v2264_v0 = vld [vmem:[%s2979_s3 + $0x18] ss:$52 sps:$4 sm:$0xff]  }
  0x6b   :  { %1319 = vmatpush1.bf16.msra.mxu0 %v2249_v2  ;;  %1360 = vmatpush1.bf16.msra.mxu1 %v2252_v3  ;;  %v2258_v59 = vld [vmem:[%s2979_s3 + $0x80] ss:$52 sps:$4 sm:$0xff]   ;;  %v2261_v63 = vld [vmem:[%s2979_s3 + $0x10] ss:$52 sps:$4 sm:$0xff]   ;;  %v2267_v3 = vld [vmem:[%s2979_s3 + $0x88] ss:$52 sps:$4 sm:$0xff]  }
  0x6c   :  { %1398 = vmatprep.subr.bf16.mxu0 %v2257_v4  ;;  %1439 = vmatprep.subr.bf16.mxu1 %v2260_v6  ;;  %v2269_v1 = vld [vmem:[%s2979_s3 + $0x8c] ss:$52 sps:$4 sm:$0xff]   ;;  %v2272_v2 = vld [vmem:[%s2979_s3 + $0x94] ss:$52 sps:$4 sm:$0xff]   ;;  %v2270_v4 = vld [vmem:[%s2979_s3 + $0x90] ss:$52 sps:$4 sm:$0xff]  }
  0x6d   :  { %1738 = vperm.xlu1 %2145, %v2823_v7   ;;  %v2275_v6 = vld [vmem:[%s2979_s3 + $0x24] ss:$52 sps:$4 sm:$0xff]   ;;  %vm1681_vm2 = vcmask 1041408   ;;  %vm1749_vm8 = vcmask 1024   ;;  %s2366_s29 = smov [#allocation2]   ;;  %s2367_s9 = smov [#allocation5]  }
  0x6e   :  { %s1811_s30 = sshll.u32 %s2366_s29, 4  ;;  %s1821_s10 = sshll.u32 %s2367_s9, 4  ;;  %s1812_s30 = int_to_ptr.vmem [resolvable:$true] %s1811_s30  ;;  %s1822_s10 = int_to_ptr.vmem [resolvable:$true] %s1821_s10 }
  0x6f   :  { %s2309_s11 = scalar_lea.vmem %s1812_s30, 768  ;;  %p2314_p1 = scmp.lt.s32.totalorder %s1812_s30, %s1812_s30 }
  0x70   :  { %p2310_p0 = scmp.ne.s32.totalorder %s1812_s30, %s2309_s11  ;;  %p2315_p2 = scmp.lt.s32.totalorder %s2309_s11, %s2309_s11 }
  0x72   :  { %p2316_p3 = por %p2315_p2, %p2314_p1 }
  0x74   :  { %p2317_p4 = pnand %p2316_p3, %p2310_p0 }
  0xe3   :  { %v2006_v10 = vpop.f32.mrf.mxu0 }
  0xe4   :  { %v2028_v11 = vpop.f32.mrf.mxu1 }
  0xe5   :  { %v2007_v14 = vpop.f32.mrf.mxu0 }
  0xe6   :  { %v2029_v15 = vpop.f32.mrf.mxu1  ;;  %v2008_v28 = vadd.f32 %v2007_v14, %v2006_v10  ;;  %v2278_v10 = vld [vmem:[%s2979_s3 + $0x2c] ss:$52 sps:$4 sm:$0xff]   ;;  %v2276_v14 = vld [vmem:[%s2979_s3 + $0x28] ss:$52 sps:$4 sm:$0xff]  }
  0xe7   :  { %v2009_v16 = vpop.f32.mrf.mxu0  ;;  %v2030_v31 = vadd.f32 %v2029_v15, %v2028_v11  ;;  %v2273_v11 = vld [vmem:[%s2979_s3 + $0x20] ss:$52 sps:$4 sm:$0xff]   ;;  %v2279_v15 = vld [vmem:[%s2979_s3 + $0x98] ss:$52 sps:$4 sm:$0xff]  }
  0xe8   :  { %v2031_v17 = vpop.f32.mrf.mxu1  ;;  %v864_v30 = vadd.f32 %v2008_v28, %v1846_v29  ;;  %v2364_v16 = vmov 0.0  }
  0xe9   :  { %v2010_v18 = vpop.f32.mrf.mxu0  ;;  %v2280_v17 = vld [vmem:[%s2979_s3 + $0x30] ss:$52 sps:$4 sm:$0xff]  }
  0xea   :  { %v2032_v19 = vpop.f32.mrf.mxu1  ;;  %v904_v36 = vadd.f32 %v2030_v31, %v864_v30 }
 0x103   :  { %v2050_v20 = vpop.f32.mrf.mxu0 }
 0x104   :  { %v2072_v21 = vpop.f32.mrf.mxu1 }
 0x105   :  { %v2051_v22 = vpop.f32.mrf.mxu0 }
 0x106   :  { %v2073_v23 = vpop.f32.mrf.mxu1  ;;  %v2052_v35 = vadd.f32 %v2051_v22, %v2050_v20 }
 0x107   :  { %v2053_v24 = vpop.f32.mrf.mxu0  ;;  %v2074_v39 = vadd.f32 %v2073_v23, %v2072_v21  ;;  %v1099_v21 = vld [vmem:[%s2980_s4] sm:$0xff] }
 0x108   :  { %v2075_v25 = vpop.f32.mrf.mxu1  ;;  %v944_v37 = vadd.f32 %v2052_v35, %v904_v36 }
 0x109   :  { %v2054_v26 = vpop.f32.mrf.mxu0 }
 0x10a   :  { %v2076_v27 = vpop.f32.mrf.mxu1  ;;  %v984_v43 = vadd.f32 %v2074_v39, %v944_v37 }
 0x123   :  { %v2094_v40 = vpop.f32.mrf.mxu0 }
 0x124   :  { %v2116_v41 = vpop.f32.mrf.mxu1 }
 0x125   :  { %v2095_v42 = vpop.f32.mrf.mxu0 }
 0x126   :  { %v2096_v44 = vadd.f32 %v2095_v42, %v2094_v40  ;;  %v2117_v45 = vpop.f32.mrf.mxu1 }
 0x127   :  { %v2097_v46 = vpop.f32.mrf.mxu0  ;;  %v2118_v48 = vadd.f32 %v2117_v45, %v2116_v41 }
 0x128   :  { %v1024_v47 = vadd.f32 %v2096_v44, %v984_v43  ;;  %v2119_v49 = vpop.f32.mrf.mxu1 }
 0x129   :  { %v2098_v50 = vpop.f32.mrf.mxu0 }
 0x12a   :  { %v1064_v51 = vadd.f32 %v2118_v48, %v1024_v47  ;;  %v2120_v53 = vpop.f32.mrf.mxu1 }
 0x12c   :  { %v1069_v57 = vmax.f32 %v1064_v51, 0.0 }
 0x12e   :  { %v1070_v60 = vpack.c.bf16 %v1069_v57, %v1069_v57 }
 0x130   :  { %1969 = vmatmul.mubr.msk.bf16.vlgmr.msra.gmra.mxu0 %vm1300_vm0, %v1070_v60  ;;  %1970 = vmatmul.mubr.msk.bf16.vlgmr.msra.gmra.mxu1 %vm1300_vm0, %v1070_v60 }
 0x131   :  { %1399 = vmatpush1.bf16.msra.mxu0 %v2255_v58  ;;  %1440 = vmatpush1.bf16.msra.mxu1 %v2258_v59 }
 0x132   :  { %1400 = vmatprep.subr.bf16.mxu0 %v2263_v61  ;;  %1441 = vmatprep.subr.bf16.mxu1 %v2266_v62  ;;  %v1100_v62 = vld [vmem:[%s2980_s4 + $0x8] sm:$0x1f] }
 0x133   :  { %1418 = vmatprep.mubr.bf16.mxu0 %v2363_v5  ;;  %1459 = vmatprep.mubr.bf16.mxu1 %v2363_v5 }
 0x135   :  { %1401 = vmatpush1.bf16.msra.mxu0 %v2261_v63  ;;  %1442 = vmatpush1.bf16.msra.mxu1 %v2264_v0 }
 0x136   :  { %1480 = vmatprep.subr.bf16.mxu0 %v2269_v1  ;;  %1521 = vmatprep.subr.bf16.mxu1 %v2272_v2 }
 0x138   :  { %1971 = vmatmul.mubr.msk.bf16.vlgmr.msra.gmra.mxu0 %vm1300_vm0, %v1070_v60  ;;  %1972 = vmatmul.mubr.msk.bf16.vlgmr.msra.gmra.mxu1 %vm1300_vm0, %v1070_v60 }
 0x139   :  { %1481 = vmatpush1.bf16.msra.mxu0 %v2267_v3  ;;  %1522 = vmatpush1.bf16.msra.mxu1 %v2270_v4 }
 0x13a   :  { %1482 = vmatprep.subr.bf16.mxu0 %v2275_v6  ;;  %1523 = vmatprep.subr.bf16.mxu1 %v2278_v10 }
 0x13b   :  { %1500 = vmatprep.mubr.bf16.mxu0 %v2363_v5  ;;  %1541 = vmatprep.mubr.bf16.mxu1 %v2363_v5  ;;  %v1103_v5 = vlaneseq }
 0x13d   :  { %1483 = vmatpush1.bf16.msra.mxu0 %v2273_v11  ;;  %1524 = vmatpush1.bf16.msra.mxu1 %v2276_v14  ;;  %v2892_v18 = vshrl.u32 %v1103_v5, 7 }
 0x13e   :  { %2125 = vmatprep.subr.bf16.mxu0 %v2364_v16 }
 0x13f   :  { %v1105_v19 = vsub.s32 0, %v2892_v18  ;;  %v1113_v20 = vsub.s32 2, %v2892_v18  ;;  %v1109_v22 = vsub.s32 1, %v2892_v18  ;;  %v1117_v23 = vsub.s32 3, %v2892_v18 }
 0x140   :  { %1973 = vmatmul.mubr.msk.bf16.vlgmr.msra.gmra.mxu0 %vm1300_vm0, %v1070_v60  ;;  %1974 = vmatmul.mubr.msk.bf16.vlgmr.msra.gmra.mxu1 %vm1300_vm0, %v1070_v60  ;;  %v1121_v35 = vsub.s32 4, %v2892_v18  ;;  %v1129_v36 = vsub.s32 6, %v2892_v18  ;;  %v1125_v40 = vsub.s32 5, %v2892_v18  ;;  %v1133_v43 = vsub.s32 7, %v2892_v18 }
 0x141   :  { %2126 = vmatpush3.bf16.msra.mxu0 %v2279_v15  ;;  %2129 = vmatprep.mubr.msk.bf16.mxu0 %vm2365_vm1, %v2364_v16  ;;  %v1106_v24 = vrot.slane %v1099_v21, %v1105_v19  ;;  %v1114_v25 = vrot.slane %v1099_v21, %v1113_v20  ;;  %v1110_v26 = vrot.slane %v1099_v21, %v1109_v22 }
 0x142   :  { %2127 = vmatprep.subr.bf16.mxu0 %v2364_v16  ;;  %v1118_v27 = vrot.slane %v1099_v21, %v1117_v23  ;;  %v1122_v46 = vrot.slane %v1099_v21, %v1121_v35  ;;  %v1130_v47 = vrot.slane %v1099_v21, %v1129_v36  ;;  %v1126_v50 = vrot.slane %v1099_v21, %v1125_v40 }
 0x143   :  { %v1134_v51 = vrot.slane %v1099_v21, %v1133_v43  ;;  %v1138_v3 = vrot.slane %v1100_v62, %v1105_v19  ;;  %v1146_v4 = vrot.slane %v1100_v62, %v1113_v20  ;;  %v1142_v11 = vrot.slane %v1100_v62, %v1109_v22 }
 0x144   :  { %v1150_v21 = vrot.slane %v1100_v62, %v1117_v23  ;;  %v1154_v40 = vrot.slane %v1100_v62, %v1121_v35 }
 0x145   :  { %2128 = vmatpush3.bf16.msra.mxu0 %v2280_v17 }
 0x148   :  { %2130 = vmatmul.mubr.msk.bf16.vlgmr.msra.gmra.mxu0 %vm1300_vm0, %v1070_v60 }
 0x1f0   :  { %v1338_v28 = vpop.f32.mrf.mxu0  ;;  %v1379_v29 = vpop.f32.mrf.mxu1 }
 0x1f1   :  { %v1339_v30 = vadd.f32 %v1338_v28, %v1106_v24  ;;  %v1380_v31 = vadd.f32 %v1379_v29, %v1114_v25 }
 0x1f2   :  { %v1340_v37 = vpop.f32.mrf.mxu0  ;;  %v1381_v39 = vpop.f32.mrf.mxu1 }
 0x1f3   :  { %2281 = vtanh.f32 %v1339_v30  ;;  %v1341_v41 = vadd.f32 %v1340_v37, %v1110_v26  ;;  %v1382_v42 = vadd.f32 %v1381_v39, %v1118_v27 }
 0x1f4   :  { %2283 = vtanh.f32 %v1380_v31  ;;  %v1342_v44 = vpop.f32.mrf.mxu0  ;;  %v1383_v45 = vpop.f32.mrf.mxu1 }
 0x1f5   :  { %2285 = vtanh.f32 %v1341_v41 }
 0x1f6   :  { %2287 = vtanh.f32 %v1382_v42  ;;  %v1343_v48 = vpop.f32.mrf.mxu0  ;;  %v1384_v49 = vpop.f32.mrf.mxu1 }
 0x1f8   :  { %v1420_v53 = vpop.f32.mrf.mxu0  ;;  %v1461_v57 = vpop.f32.mrf.mxu1 }
 0x1f9   :  { %v1421_v58 = vadd.f32 %v1420_v53, %v1122_v46  ;;  %v1462_v59 = vadd.f32 %v1461_v57, %v1130_v47 }
 0x1fa   :  { %v1422_v60 = vpop.f32.mrf.mxu0  ;;  %v1463_v61 = vpop.f32.mrf.mxu1 }
 0x1fb   :  { %2289 = vtanh.f32 %v1421_v58  ;;  %v1423_v63 = vadd.f32 %v1422_v60, %v1126_v50  ;;  %v1464_v0 = vadd.f32 %v1463_v61, %v1134_v51 }
 0x1fc   :  { %2291 = vtanh.f32 %v1462_v59  ;;  %v1424_v1 = vpop.f32.mrf.mxu0  ;;  %v1465_v2 = vpop.f32.mrf.mxu1 }
 0x1fd   :  { %2293 = vtanh.f32 %v1423_v63 }
 0x1fe   :  { %2295 = vtanh.f32 %v1464_v0  ;;  %v1425_v6 = vpop.f32.mrf.mxu0  ;;  %v1466_v10 = vpop.f32.mrf.mxu1 }
 0x200   :  { %v2282_v14 = vpop.eup %2281  ;;  %v1502_v15 = vpop.f32.mrf.mxu0 }
 0x201   :  { %v1543_v17 = vpop.f32.mrf.mxu1  ;;  %v2284_v24 = vpop.eup %2283  ;;  %v1657_v25 = vsub.f32 %v2282_v14, %v2523_v34  ;;  %v1503_v26 = vadd.f32 %v1502_v15, %v1138_v3 }
 0x202   :  { %v1544_v27 = vadd.f32 %v1543_v17, %v1146_v4  ;;  %v2286_v28 = vpop.eup %2285  ;;  %v1659_v29 = vsub.f32 %v2284_v24, %v2534_v38  ;;  %v1504_v30 = vpop.f32.mrf.mxu0 }
 0x203   :  { %v1545_v19 = vpop.f32.mrf.mxu1  ;;  %v2288_v20 = vpop.eup %2287  ;;  %v1669_v31 = vmul.f32 %v1657_v25, %v1657_v25  ;;  %v1658_v36 = vsub.f32 %v2286_v28, %v2513_v32  ;;  %2297 = vtanh.f32 %v1503_v26  ;;  %v1505_v22 = vadd.f32 %v1504_v30, %v1142_v11 }
 0x204   :  { %v1660_v37 = vsub.f32 %v2288_v20, %v2518_v33  ;;  %2299 = vtanh.f32 %v1544_v27  ;;  %v1546_v23 = vadd.f32 %v1545_v19, %v1150_v21  ;;  %v1506_v39 = vpop.f32.mrf.mxu0  ;;  %v1671_v41 = vmul.f32 %v1659_v29, %v1659_v29 }
 0x205   :  { %v1547_v34 = vpop.f32.mrf.mxu1  ;;  %v1670_v42 = vmul.f32 %v1658_v36, %v1658_v36  ;;  %2301 = vtanh.f32 %v1505_v22  ;;  %v1984_v38 = vpack.c.bf16 %v2286_v28, %v2282_v14  ;;  %v2917_v32 = vand.u32 127, %v1103_v5 }
 0x206   :  { %2303 = vtanh.f32 %v1546_v23  ;;  %v1507_v43 = vpop.f32.mrf.mxu0  ;;  %v1985_v45 = vpack.c.bf16 %v2288_v20, %v2284_v24  ;;  %v1682_v33 = vsel %vm1681_vm2, %v1669_v31, 0.0  ;;  %v1672_v47 = vmul.f32 %v1660_v37, %v1660_v37 }
 0x207   :  { %v1548_v44 = vpop.f32.mrf.mxu1  ;;  %v1683_v46 = vsel %vm1681_vm2, %v1670_v42, 0.0  ;;  %1650 = vst [vmem:[#allocation2] sm:$0xff] %v1984_v38  ;;  %v1685_v50 = vsel %vm1681_vm2, %v1671_v41, 0.0  ;;  %vm1722_vm3 = vcmp.lt.s32.totalorder %v2917_v32, 4 }
 0x208   :  { %v2290_v48 = vpop.eup %2289  ;;  %v1684_v18 = vadd.f32 %v1683_v46, %v1682_v33  ;;  %v1584_v35 = vpop.f32.mrf.mxu0  ;;  %1651 = vst [vmem:[#allocation2 + $0x8] sm:$0xff] %v1985_v45  ;;  %v1687_v61 = vsel %vm1681_vm2, %v1672_v47, 0.0 }
 0x209   :  { %v2292_v49 = vpop.eup %2291  ;;  %v1661_v51 = vsub.f32 %v2290_v48, %v2651_v12  ;;  %v2923_v53 = vadd.f32 %v1584_v35, %v1154_v40 }
 0x20a   :  { %v2294_v5 = vpop.eup %2293  ;;  %v2131_v57 = vpop.f32.mrf.mxu0  ;;  %v1663_v58 = vsub.f32 %v2292_v49, %v2656_v13  ;;  %v1686_v59 = vadd.f32 %v1685_v50, %v1684_v18 }
 0x20b   :  { %v2296_v60 = vpop.eup %2295  ;;  %v1673_v62 = vmul.f32 %v1661_v51, %v1661_v51  ;;  %v1662_v63 = vsub.f32 %v2294_v5, %v2637_v8  ;;  %1656 = vst [vmem:[#allocation5] sm:$0xff] %v2923_v53  ;;  %v1723_v12 = vsel %vm1722_vm3, %v2923_v53, -1e+30  ;;  %v1986_v10 = vpack.c.bf16 %v2294_v5, %v2290_v48 }
 0x20c   :  { %v1587_v0 = vpop.f32.mrf.mxu0  ;;  %v1724_v1 = vsel %vm1681_vm2, %v1723_v12, -inf  ;;  %v1664_v2 = vsub.f32 %v2296_v60, %v2642_v9  ;;  %v1688_v3 = vadd.f32 %v1687_v61, %v1686_v59  ;;  %v1675_v4 = vmul.f32 %v1663_v58, %v1663_v58 }
 0x20d   :  { %v1674_v13 = vmul.f32 %v1662_v63, %v1662_v63  ;;  %1725 = vmax.xlane.f32.xlu0 %v1724_v1  ;;  %v1689_v6 = vsel %vm1681_vm2, %v1673_v62, 0.0  ;;  %v1987_v14 = vpack.c.bf16 %v2296_v60, %v2292_v49  ;;  %1652 = vst [vmem:[#allocation2 + $0x10] sm:$0xff] %v1986_v10 }
 0x20e   :  { %v2132_v11 = vpop.f32.mrf.mxu0  ;;  %v1690_v8 = vadd.f32 %v1689_v6, %v1688_v3  ;;  %v1676_v15 = vmul.f32 %v1664_v2, %v1664_v2  ;;  %v1693_v26 = vsel %vm1681_vm2, %v1675_v4, 0.0 }
 0x20f   :  { %v1691_v17 = vsel %vm1681_vm2, %v1674_v13, 0.0  ;;  %1653 = vst [vmem:[#allocation2 + $0x18] sm:$0xff] %v1987_v14 }
 0x210   :  { %v2298_v21 = vpop.eup %2297  ;;  %v1692_v24 = vadd.f32 %v1691_v17, %v1690_v8  ;;  %v1695_v31 = vsel %vm1681_vm2, %v1676_v15, 0.0 }
 0x211   :  { %v2300_v25 = vpop.eup %2299  ;;  %v1665_v9 = vsub.f32 %v2298_v21, %v2773_v55 }
 0x212   :  { %v2302_v27 = vpop.eup %2301  ;;  %v1667_v28 = vsub.f32 %v2300_v25, %v2778_v56  ;;  %v1694_v29 = vadd.f32 %v1693_v26, %v1692_v24 }
 0x213   :  { %v2304_v30 = vpop.eup %2303  ;;  %v1666_v19 = vsub.f32 %v2302_v27, %v2761_v52  ;;  %v1677_v20 = vmul.f32 %v1665_v9, %v1665_v9  ;;  %v1988_v36 = vpack.c.bf16 %v2302_v27, %v2298_v21 }
 0x214   :  { %v1668_v22 = vsub.f32 %v2304_v30, %v2768_v54  ;;  %v1696_v37 = vadd.f32 %v1695_v31, %v1694_v29  ;;  %v1989_v23 = vpack.c.bf16 %v2304_v30, %v2300_v25  ;;  %v1679_v34 = vmul.f32 %v1667_v28, %v1667_v28  ;;  %v1739_v54 = vpop.permute.xlu1 %1738 }
 0x215   :  { %v1678_v39 = vmul.f32 %v1666_v19, %v1666_v19  ;;  %v1697_v55 = vsel %vm1681_vm2, %v1677_v20, 0.0  ;;  %1654 = vst [vmem:[#allocation2 + $0x20] sm:$0xff] %v1988_v36  ;;  %vm1740_vm4 = vcmp.eq.s32.totalorder %v2917_v32, %v1739_v54 }
 0x216   :  { %v1698_v40 = vadd.f32 %v1697_v55, %v1696_v37  ;;  %1655 = vst [vmem:[#allocation2 + $0x28] sm:$0xff] %v1989_v23  ;;  %v1680_v56 = vmul.f32 %v1668_v22, %v1668_v22  ;;  %v1701_v52 = vsel %vm1681_vm2, %v1679_v34, 0.0  ;;  %vm1741_vm5 = vmand %vm1740_vm4, %vm1722_vm3 }
 0x217   :  { %v1699_v41 = vsel %vm1681_vm2, %v1678_v39, 0.0  ;;  %v1982_v18 = vsel %vm1741_vm5, 1.0, %v2364_v16 }
 0x218   :  { %v1700_v42 = vadd.f32 %v1699_v41, %v1698_v40  ;;  %v1703_v43 = vsel %vm1681_vm2, %v1680_v56, 0.0  ;;  %v1744_v50 = vmul.f32 %v1982_v18, %v2923_v53 }
 0x21a   :  { %v1702_v38 = vadd.f32 %v1701_v52, %v1700_v42  ;;  %v1745_v51 = vsel %vm1681_vm2, %v1744_v50, 0.0 }
 0x21c   :  { %v1704_v44 = vadd.f32 %v1703_v43, %v1702_v38 }
 0x296   :  { %v1726_v45 = vpop.xlane.xlu0 %1725 }
 0x297   :  { %v1727_v33 = vsub.f32 %v1723_v12, %v1726_v45  ;;  %vm1763_vm6 = vcmp.eq.f32.partialorder %v1723_v12, %v1726_v45 }
 0x298   :  { %v1764_v46 = vsel %vm1763_vm6, %v2917_v32, 128 }
 0x299   :  { %v1728_v47 = vmul.f32 1.442695, %v1727_v33  ;;  %v1765_v48 = vsel %vm1681_vm2, %v1764_v46, 2147483647 }
 0x29a   :  { %v1767_v35 = vshra.s32 %v1765_v48, 16  ;;  %v1766_v59 = vand.u32 65535, %v1765_v48 }
 0x29b   :  { %2305 = vpow2.f32 %v1728_v47 }
 0x29c   :  { %v1769_v49 = vcvt.s32.f32 %v1767_v35  ;;  %v1768_v61 = vcvt.s32.f32 %v1766_v59 }
 0x29e   :  { %1770 = vmin.xlane.f32.xlu0 %v1769_v49 }
 0x2a2   :  { %1746 = vadd.xlane.f32.xlu0 %v1745_v51 }
 0x2a8   :  { %v2306_v5 = vpop.eup %2305 }
 0x2a9   :  { %v1730_v57 = vsel %vm1722_vm3, %v2306_v5, 0.0 }
 0x2aa   :  { %v1731_v58 = vsel %vm1681_vm2, %v1730_v57, 0.0 }
 0x2ab   :  { %1732 = vadd.xlane.f32.xlu1 %v1731_v58 }
 0x327   :  { %v1771_v60 = vpop.xlane.xlu0 %1770 }
 0x328   :  { %vm1772_vm7 = vcmp.eq.f32.partialorder %v1769_v49, %v1771_v60  ;;  %v1777_v3 = vcvt.f32.s32 %v1771_v60 }
 0x329   :  { %v1773_v62 = vsel %vm1772_vm7, %v1768_v61, inf }
 0x32a   :  { %1774 = vmin.xlane.f32.xlu0 %v1773_v62  ;;  %v1778_v4 = vshll.u32 %v1777_v3, 16 }
 0x32b   :  { %v1747_v1 = vpop.xlane.xlu0 %1746 }
 0x32e   :  { %1705 = vadd.xlane.f32.xlu0 %v1704_v44 }
 0x334   :  { %v1733_v63 = vpop.xlane.xlu1 %1732 }
 0x335   :  { %2307 = vlog2.f32 %v1733_v63 }
 0x342   :  { %v2308_v53 = vpop.eup %2307 }
 0x343   :  { %v1735_v12 = vmul.f32 0.6931472, %v2308_v53 }
 0x345   :  { %v1736_v0 = vadd.f32 %v1735_v12, %v1726_v45 }
 0x347   :  { %v1748_v2 = vsub.f32 %v1736_v0, %v1747_v1 }
 0x349   :  { %v1750_v32 = vsel %vm1749_vm8, %v1748_v2, 0.0 }
 0x34a   :  { %1751 = vadd.xlane.f32.xlu0 %v1750_v32 }
 0x3b3   :  { %v1775_v13 = vpop.xlane.xlu0 %1774 }
 0x3b4   :  { %v1776_v6 = vcvt.f32.s32 %v1775_v13 }
 0x3b6   :  { %v1779_v10 = vadd.s32 %v1778_v4, %v1776_v6 }
 0x3b7   :  { %v1706_v11 = vpop.xlane.xlu0 %1705 }
 0x3b8   :  { %v1707_v8 = vrot.slane %v1706_v11, 4  ;;  %vm1780_vm9 = vcmp.eq.s32.totalorder %v1779_v10, %v2823_v7 }
 0x3b9   :  { %v1983_v14 = vsel %vm1780_vm9, 1.0, %v2364_v16 }
 0x3ba   :  { %v1708_v15 = vadd.f32 %v1707_v8, %v1706_v11  ;;  %v1783_v17 = vsel %vm1749_vm8, %v1983_v14, 0.0 }
 0x3bb   :  { %1784 = vadd.xlane.f32.xlu0 %v1783_v17 }
 0x3bc   :  { %v1709_v21 = vrot.slane %v1708_v15, 2 }
 0x3be   :  { %v1710_v24 = vadd.f32 %v1709_v21, %v1708_v15 }
 0x3c0   :  { %v1711_v25 = vrot.slane %v1710_v24, 1 }
 0x3c2   :  { %v1712_v9 = vadd.f32 %v1711_v25, %v1710_v24 }
 0x3c4   :  { %2133 = vpush %v1712_v9 }
 0x3d3   :  { %v1752_v26 = vpop.xlane.xlu0 %1751 }
 0x3d4   :  { %v1753_v27 = vrot.slane %v1752_v26, 4 }
 0x3d6   :  { %v1754_v28 = vadd.f32 %v1753_v27, %v1752_v26 }
 0x3d8   :  { %v1755_v29 = vrot.slane %v1754_v28, 2 }
 0x3da   :  { %v1756_v30 = vadd.f32 %v1755_v29, %v1754_v28 }
 0x3dc   :  { %v1757_v19 = vrot.slane %v1756_v30, 1 }
 0x3de   :  { %v1758_v20 = vadd.f32 %v1757_v19, %v1756_v30 }
 0x3e0   :  { %2135 = vpush %v1758_v20 }
 0x3f5   :  { %s2960_s4 = spop %2133 }
 0x3f6   :  { %s1716_s28 = smul.f32 0.00032552084, %s2960_s4 }
 0x3f8   :  { %1718 = sst [smem:[#allocation7]] %s1716_s28 }
 0x3f9   :  { %2320 = shalt.err (!%p2317_p4)
}
 0x3fa   :  { %1814 = dma.vmem_to_hbm [thread:$0]  %s1812_s30, 768, %s2982_s6, [#allocation3]  }
 0x3fb   :  { %s2329_s14 = scalar_lea.vmem %s1822_s10, 128  ;;  %p2334_p6 = scmp.lt.s32.totalorder %s1822_s10, %s1822_s10 }
 0x3fc   :  { %p2330_p5 = scmp.ne.s32.totalorder %s1822_s10, %s2329_s14  ;;  %p2335_p7 = scmp.lt.s32.totalorder %s2329_s14, %s2329_s14 }
 0x3fe   :  { %p2336_p8 = por %p2335_p7, %p2334_p6 }
 0x400   :  { %p2337_p9 = pnand %p2336_p8, %p2330_p5 }
 0x402   :  { %2340 = shalt.err (!%p2337_p9)
}
 0x403   :  { %1824 = dma.vmem_to_hbm [thread:$0]  %s1822_s10, 128, %s2983_s7, [#allocation6]  }
 0x404   :  { %s2368_s7 = smov [#allocation7]  }
 0x411   :  { %s2136_s17 = spop %2135 }
 0x412   :  { %s1762_s18 = smul.f32 0.5, %s2136_s17 }
 0x414   :  { %p1796_p10 = scmp.ne.f32.partialorder %s1762_s18, %s1762_s18  ;;  %1800 = sst [smem:[#allocation7 + $0x1]] %s1762_s18 }
 0x416   :  { %s2986_s18 = smov (%p1796_p10, %s1762_s18), 0.0 }
 0x417   :  { %s1798_s19 = sadd.f32 %s2986_s18, %s1716_s28 }
 0x419   :  { %1802 = sst [smem:[#allocation7 + $0x2]] %s1798_s19 }
 0x444   :  { %v1785_v7 = vpop.xlane.xlu0 %1784 }
 0x445   :  { %v1786_v16 = vrot.slane %v1785_v7, 4 }
 0x447   :  { %v1787_v31 = vadd.f32 %v1786_v16, %v1785_v7 }
 0x449   :  { %v1788_v36 = vrot.slane %v1787_v31, 2 }
 0x44b   :  { %v1789_v22 = vadd.f32 %v1788_v36, %v1787_v31 }
 0x44d   :  { %v1790_v37 = vrot.slane %v1789_v22, 1 }
 0x44f   :  { %v1791_v23 = vadd.f32 %v1790_v37, %v1789_v22 }
 0x451   :  { %2137 = vpush %v1791_v23 }
 0x482   :  { %s2138_s6 = spop %2137 }
 0x483   :  { %s1795_s20 = smul.f32 0.5, %s2138_s6 }
 0x485   :  { %1804 = sst [smem:[#allocation7 + $0x3]] %s1795_s20 }
 0x486   :  { %1832 = dma.smem_to_hbm %s2368_s7, 16, %s2984_s8, [#allocation4]  }
 0x487   :  { %2357 = dma.done.wait [#allocation3], 768  }
 0x488   :  { %2358 = vsyncadd [#allocation3], 4294966528 }
 0x489   :  { %2359 = dma.done.wait [#allocation6], 128  }
 0x48a   :  { %2360 = vsyncadd [#allocation6], 4294967168 }
 0x48b   :  { %2361 = dma.done.wait [#allocation4], 16  }
 0x48c   :  { %2362 = vsyncadd [#allocation4], 4294967280 }
 0x48d   :  { %1842 = sfence }
 0x48e   :  { %1843 = vsyncpa [#allocation3], 1 }
 0x48f   :  { %1844 = vsyncpa [#allocation6], 1 }
 0x490   :  { %1845 = vsyncpa [#allocation4], 1 }

</bundles_post_ra>
